<compile_context>
chip_gen: v7x
topology: tpu7x:2x2x1
jax: 0.10.0
libtpu: 0.0.40
codegen_flags: <defaults>
</compile_context>

<pallas_src>
import functools

import jax
import jax.numpy as jnp
from jax import lax
from jax.experimental import pallas as pl
from jax.experimental.pallas import tpu as pltpu

LN_EPS = 1e-5                      # nn.LayerNorm default
VMEM_LIMIT = 64 * 1024 * 1024      # explicit scoped-VMEM budget


# ----------------------------------------------------------------------------
# Kernel 1: q = x @ Wq ; LayerNorm(dim_head) per (h, p) ; dots = q @ K^T
# Output columns are ordered (h, p, n) so the wrapper only needs a reshape.
# ----------------------------------------------------------------------------
def _qk_dots_kernel(x_ref, wq_ref, keys_ref, gamma_ref, beta_ref, dots_ref,
                    *, heads, dim_head, num_keys):
    # (tm, D)bf16 @ (D, 2*H*dh)bf16 -> (tm, 2*H*dh)f32, columns ordered (p,h,d)
    q = jnp.dot(x_ref[...], wq_ref[...], preferred_element_type=jnp.float32)
    gamma = gamma_ref[...]  # (1, dh) f32
    beta = beta_ref[...]    # (1, dh) f32
    for h in range(heads):          # static small loop (2*heads total iters)
        for p in range(2):
            c0 = (p * heads + h) * dim_head        # query column ordering (p,h,d)
            q_ph = q[:, c0:c0 + dim_head]          # (tm, dh) f32
            mean = jnp.mean(q_ph, axis=-1, keepdims=True)
            var = jnp.mean((q_ph - mean) ** 2, axis=-1, keepdims=True)
            qn = (q_ph - mean) * lax.rsqrt(var + LN_EPS) * gamma + beta
            hp = h * 2 + p                         # output column ordering (h,p,n)
            # (tm, dh)bf16 @ (dh, N)bf16 -> (tm, N)f32
            dots_ref[:, hp * num_keys:(hp + 1) * num_keys] = jnp.dot(
                qn.astype(jnp.bfloat16), keys_ref[hp],
                preferred_element_type=jnp.float32)


def qk_dots(x_flat, wq, keys_r, gamma, beta, *, heads, dim_head, num_keys,
            row_tile):
    bt, d = x_flat.shape
    ph_total = 2 * heads
    assert bt % row_tile == 0
    kernel = functools.partial(_qk_dots_kernel, heads=heads,
                               dim_head=dim_head, num_keys=num_keys)
    return pl.pallas_call(
        kernel,
        out_shape=jax.ShapeDtypeStruct((bt, ph_total * num_keys), jnp.float32),
        grid_spec=pltpu.PrefetchScalarGridSpec(
            num_scalar_prefetch=0,
            grid=(bt // row_tile,),
            in_specs=[
                pl.BlockSpec((row_tile, d), lambda i: (i, 0)),
                pl.BlockSpec((d, ph_total * dim_head), lambda i: (0, 0)),
                pl.BlockSpec((ph_total, dim_head, num_keys),
                             lambda i: (0, 0, 0)),
                pl.BlockSpec((1, dim_head), lambda i: (0, 0)),
                pl.BlockSpec((1, dim_head), lambda i: (0, 0)),
            ],
            out_specs=pl.BlockSpec((row_tile, ph_total * num_keys),
                                   lambda i: (i, 0)),
        ),
        compiler_params=pltpu.CompilerParams(
            dimension_semantics=("parallel",),
            vmem_limit_bytes=VMEM_LIMIT),
    )(x_flat, wq, keys_r, gamma, beta)


# ----------------------------------------------------------------------------
# Kernel 2: per-head softmax + weighted EmbeddingBag('sum') via one-hot matmul.
# Attention weights folded into the one-hot (no 3-D onehot/iota intermediate).
# ----------------------------------------------------------------------------
def _bag_kernel(scores_ref, idx_ref, values_ref, out_ref, *, heads, k,
                n_values):
    tm = scores_ref.shape[0]
    s = scores_ref[...]                                   # (tm, H*K) f32
    idx = idx_ref[...]                                    # (tm, H*K) int32
    iota = lax.broadcasted_iota(jnp.int32, (tm, n_values), 1)
    w = jnp.zeros((tm, n_values), jnp.float32)
    for h in range(heads):                                # static small loops
        sh = s[:, h * k:(h + 1) * k]
        sh = sh - jnp.max(sh, axis=-1, keepdims=True)
        eh = jnp.exp(sh)
        ah = eh / jnp.sum(eh, axis=-1, keepdims=True)     # per-head softmax
        for j in range(k):
            col = h * k + j
            # duplicate indices accumulate their weights, exactly like
            # nn.EmbeddingBag(mode='sum') with per_sample_weights.
            w = w + jnp.where(iota == idx[:, col:col + 1],
                              ah[:, j:j + 1], 0.0)
    # Tiny matmul (HK non-zeros per row); kept f32 HIGHEST so the lookup is an
    # exact EmbeddingBag (negligible FLOPs vs kernel 1).
    out_ref[...] = jnp.dot(w, values_ref[...],
                           precision=lax.Precision.HIGHEST,
                           preferred_element_type=jnp.float32)


def embedding_bag(scores, value_indices, values, *, heads, k, row_tile):
    bt, hk = scores.shape
    n_values, dim = values.shape
    assert hk == heads * k and bt % row_tile == 0
    kernel = functools.partial(_bag_kernel, heads=heads, k=k,
                               n_values=n_values)
    return pl.pallas_call(
        kernel,
        out_shape=jax.ShapeDtypeStruct((bt, dim), jnp.float32),
        grid_spec=pltpu.PrefetchScalarGridSpec(
            num_scalar_prefetch=0,
            grid=(bt // row_tile,),
            in_specs=[
                pl.BlockSpec((row_tile, hk), lambda i: (i, 0)),
                pl.BlockSpec((row_tile, hk), lambda i: (i, 0)),
                pl.BlockSpec((n_values, dim), lambda i: (0, 0)),
            ],
            out_specs=pl.BlockSpec((row_tile, dim), lambda i: (i, 0)),
        ),
        compiler_params=pltpu.CompilerParams(
            dimension_semantics=("parallel",),
            vmem_limit_bytes=VMEM_LIMIT),
    )(scores, value_indices, values)


# ----------------------------------------------------------------------------
# One-time parameter preprocessing (hoisted out of the forward pass)
# ----------------------------------------------------------------------------
def prepare_pkm_params(raw, *, heads, dim_head, num_keys):
    # keys: (H, N, 2, dh) -> (H, 2, dh, N) -> (2H, dh, N) with index hp = h*2+p
    keys_r = jnp.transpose(raw["keys"], (0, 2, 3, 1)).reshape(
        2 * heads, dim_head, num_keys)
    return {
        "wq": raw["wq"].astype(jnp.bfloat16),        # (D, 2*H*dh), cols (p,h,d)
        "keys_r": keys_r.astype(jnp.bfloat16),
        "values": raw["values"],                     # kept f32 (exact bag)
        "gamma": raw["gamma"],
        "beta": raw["beta"],
    }


# ----------------------------------------------------------------------------
# PKM forward (Pallas path)
# ----------------------------------------------------------------------------
def pkm_forward(x, params, *, heads, num_keys, topk, dim_head, row_tile=256):
    wq, keys_r, values = params["wq"], params["keys_r"], params["values"]
    gamma, beta = params["gamma"], params["beta"]
    b, t, d = x.shape
    bt = b * t
    rt = min(row_tile, bt)
    assert bt % rt == 0 and rt % 8 == 0
    x_flat = x.reshape(bt, d).astype(jnp.bfloat16)

    # (bt, 2H*N) f32, columns ordered (h, p, n) -> reshape only, no transpose.
    dots = qk_dots(x_flat, wq, keys_r, gamma, beta, heads=heads,
                   dim_head=dim_head, num_keys=num_keys, row_tile=rt)
    dots = dots.reshape(b, t, heads, 2, num_keys)

    # TODO(synk): the KxK cartesian combine + second top-k could be fused into
    # kernel 2 (K^2 <= 1024 candidates) to save two HBM round trips.
    scores, indices = lax.top_k(dots, topk)                  # (b,t,h,2,K)
    sx, sy = scores[..., 0, :], scores[..., 1, :]
    ix, iy = indices[..., 0, :], indices[..., 1, :]
    all_scores = (sx[..., :, None] + sy[..., None, :]).reshape(
        b, t, heads, topk * topk)
    all_indices = (ix[..., :, None] * num_keys + iy[..., None, :]).reshape(
        b, t, heads, topk * topk)

    final_topk, final_idx = lax.top_k(all_scores, topk)      # (b,t,h,K)
    value_indices = jnp.take_along_axis(all_indices, final_idx, axis=-1)

    out = embedding_bag(final_topk.reshape(bt, heads * topk),
                        value_indices.reshape(bt, heads * topk).astype(
                            jnp.int32),
                        values, heads=heads, k=topk, row_tile=rt)
    return out.reshape(b, t, d)


# ----------------------------------------------------------------------------
# Pure-JAX reference (mirrors the PyTorch forward; same bf16 matmul inputs /
# f32 accumulation as the kernels so top-k selections agree).
# ----------------------------------------------------------------------------
def pkm_reference(x, raw, *, heads, num_keys, topk, dim_head):
    wq, keys, values = raw["wq"], raw["keys"], raw["values"]
    gamma, beta = raw["gamma"], raw["beta"]
    b, t, d = x.shape
    q = jnp.einsum("btd,de->bte", x.astype(jnp.bfloat16),
                   wq.astype(jnp.bfloat16),
                   preferred_element_type=jnp.float32)
    q = q.reshape(b, t, 2, heads, dim_head)
    mean = q.mean(-1, keepdims=True)
    var = ((q - mean) ** 2).mean(-1, keepdims=True)
    qn = (q - mean) * lax.rsqrt(var + LN_EPS) * gamma[0] + beta[0]
    dots = jnp.einsum("btphd,hnpd->bthpn", qn.astype(jnp.bfloat16),
                      keys.astype(jnp.bfloat16),
                      preferred_element_type=jnp.float32)
    scores, indices = lax.top_k(dots, topk)
    sx, sy = scores[..., 0, :], scores[..., 1, :]
    ix, iy = indices[..., 0, :], indices[..., 1, :]
    all_scores = (sx[..., :, None] + sy[..., None, :]).reshape(
        b, t, heads, topk * topk)
    all_indices = (ix[..., :, None] * num_keys + iy[..., None, :]).reshape(
        b, t, heads, topk * topk)
    final_topk, final_idx = lax.top_k(all_scores, topk)
    value_indices = jnp.take_along_axis(all_indices, final_idx, axis=-1)
    attn = jax.nn.softmax(final_topk, axis=-1)
    vi = value_indices.reshape(b * t, heads * topk)
    at = attn.reshape(b * t, heads * topk)
    emb = values[vi]                                         # (bt, HK, d)
    out = jnp.sum(emb * at[..., None], axis=1)
    return out.reshape(b, t, d)


if __name__ == "__main__":
    # Small-config PKM: dim=32, heads=2, num_keys=16, topk=4, dim_head=16
    B, T, DIM = 2, 8, 32
    HEADS, NUM_KEYS, TOPK, DIM_HEAD = 2, 16, 4, 16
    DIM_QUERY = DIM_HEAD * HEADS * 2
    N_VALUES = NUM_KEYS ** 2

    key = jax.random.PRNGKey(0)
    kx, kw, kk, kv = jax.random.split(key, 4)

    x = jax.random.normal(kx, (B, T, DIM), dtype=jnp.float32)
    raw_params = {
        # nn.Linear(dim, dim_query, bias=False): weight used as x @ W
        "wq": jax.random.normal(kw, (DIM, DIM_QUERY), jnp.float32)
              * (1.0 / jnp.sqrt(DIM)),
        # nn.Parameter(heads, num_keys, 2, dim_head), std = 1/sqrt(dim_head)
        "keys": jax.random.normal(kk, (HEADS, NUM_KEYS, 2, DIM_HEAD),
                                  jnp.float32) * (1.0 / jnp.sqrt(DIM_HEAD)),
        # EmbeddingBag(num_keys**2, dim), std = 1/sqrt(dim)
        "values": jax.random.normal(kv, (N_VALUES, DIM), jnp.float32)
                  * (1.0 / jnp.sqrt(DIM)),
        # LayerNorm(dim_head)
        "gamma": jnp.ones((1, DIM_HEAD), jnp.float32),
        "beta": jnp.zeros((1, DIM_HEAD), jnp.float32),
    }

    params = prepare_pkm_params(raw_params, heads=HEADS, dim_head=DIM_HEAD,
                                num_keys=NUM_KEYS)

    out = pkm_forward(x, params, heads=HEADS, num_keys=NUM_KEYS, topk=TOPK,
                      dim_head=DIM_HEAD, row_tile=256)
    out = jax.block_until_ready(out)

    ref = pkm_reference(x, raw_params, heads=HEADS, num_keys=NUM_KEYS,
                        topk=TOPK, dim_head=DIM_HEAD)
    ref = jax.block_until_ready(ref)

    assert out.shape == (B, T, DIM)
    assert jnp.allclose(out, ref, atol=2e-3, rtol=2e-3), (
        float(jnp.max(jnp.abs(out - ref))))
    print("KERNEL_OK")
</pallas_src>

<mosaic_0001>
module attributes {stable_mosaic.version = 11 : i64} {
  func.func @_qk_dots_kernel(%arg0: i32, %arg1: memref<16x32xbf16, #tpu.memory_space<vmem>>, %arg2: memref<32x64xbf16, #tpu.memory_space<vmem>>, %arg3: memref<4x16x16xbf16, #tpu.memory_space<vmem>>, %arg4: memref<1x16xf32, #tpu.memory_space<vmem>>, %arg5: memref<1x16xf32, #tpu.memory_space<vmem>>, %arg6: memref<16x64xf32, #tpu.memory_space<vmem>>) attributes {dimension_semantics = [#tpu.dimension_semantics<parallel>], iteration_bounds = array<i64: 1>, scalar_prefetch = 0 : i64, scratch_operands = 0 : i64, tpu.core_type = #tpu.core_type<tc>, window_params = [{transform_indices = @transform_0, window_bounds = array<i64: 16, 32>}, {pipeline_mode = #tpu.pipeline_mode<synchronous>, transform_indices = @transform_1, window_bounds = array<i64: 32, 64>}, {pipeline_mode = #tpu.pipeline_mode<synchronous>, transform_indices = @transform_2, window_bounds = array<i64: 4, 16, 16>}, {pipeline_mode = #tpu.pipeline_mode<synchronous>, transform_indices = @transform_3, window_bounds = array<i64: 1, 16>}, {pipeline_mode = #tpu.pipeline_mode<synchronous>, transform_indices = @transform_4, window_bounds = array<i64: 1, 16>}, {transform_indices = @transform_5, window_bounds = array<i64: 16, 64>}]} {
    %c0 = arith.constant 0 : index
    %c0_0 = arith.constant 0 : index
    %0 = vector.load %arg1[%c0, %c0_0] : memref<16x32xbf16, #tpu.memory_space<vmem>>, vector<16x32xbf16>
    %c0_1 = arith.constant 0 : index
    %c0_2 = arith.constant 0 : index
    %1 = vector.load %arg2[%c0_1, %c0_2] : memref<32x64xbf16, #tpu.memory_space<vmem>>, vector<32x64xbf16>
    %cst = arith.constant dense<0.000000e+00> : vector<16x64xf32>
    %2 = tpu.matmul %0, %1, %cst {dimension_numbers = #tpu.dot_dimension_numbers<[1], [0], [0], [1], [0, 0, 1, 1], [], []>} : vector<16x32xbf16>, vector<32x64xbf16>, vector<16x64xf32> -> vector<16x64xf32>
    %c0_3 = arith.constant 0 : index
    %c0_4 = arith.constant 0 : index
    %3 = vector.load %arg4[%c0_3, %c0_4] : memref<1x16xf32, #tpu.memory_space<vmem>>, vector<1x16xf32>
    %c0_5 = arith.constant 0 : index
    %c0_6 = arith.constant 0 : index
    %4 = vector.load %arg5[%c0_5, %c0_6] : memref<1x16xf32, #tpu.memory_space<vmem>>, vector<1x16xf32>
    %5 = vector.extract_strided_slice %2 {offsets = [0, 0], sizes = [16, 16], strides = [1, 1]} : vector<16x64xf32> to vector<16x16xf32>
    %cst_7 = arith.constant dense<0.000000e+00> : vector<16xf32>
    %6 = vector.multi_reduction <add>, %5, %cst_7 [1] : vector<16x16xf32> to vector<16xf32>
    %7 = vector.shape_cast %6 : vector<16xf32> to vector<16x1xf32>
    %cst_8 = arith.constant 1.600000e+01 : f32
    %8 = vector.broadcast %cst_8 : f32 to vector<16x1xf32>
    %9 = arith.divf %7, %8 : vector<16x1xf32>
    %10 = vector.broadcast %9 : vector<16x1xf32> to vector<16x16xf32>
    %11 = arith.subf %5, %10 : vector<16x16xf32>
    %12 = arith.mulf %11, %11 : vector<16x16xf32>
    %cst_9 = arith.constant dense<0.000000e+00> : vector<16xf32>
    %13 = vector.multi_reduction <add>, %12, %cst_9 [1] : vector<16x16xf32> to vector<16xf32>
    %14 = vector.shape_cast %13 : vector<16xf32> to vector<16x1xf32>
    %cst_10 = arith.constant 1.600000e+01 : f32
    %15 = vector.broadcast %cst_10 : f32 to vector<16x1xf32>
    %16 = arith.divf %14, %15 : vector<16x1xf32>
    %17 = vector.broadcast %9 : vector<16x1xf32> to vector<16x16xf32>
    %18 = arith.subf %5, %17 : vector<16x16xf32>
    %cst_11 = arith.constant 9.99999974E-6 : f32
    %19 = vector.broadcast %cst_11 : f32 to vector<16x1xf32>
    %20 = arith.addf %16, %19 : vector<16x1xf32>
    %21 = math.rsqrt %20 : vector<16x1xf32>
    %22 = vector.broadcast %21 : vector<16x1xf32> to vector<16x16xf32>
    %23 = arith.mulf %18, %22 : vector<16x16xf32>
    %24 = vector.broadcast %3 : vector<1x16xf32> to vector<16x16xf32>
    %25 = arith.mulf %23, %24 : vector<16x16xf32>
    %26 = vector.broadcast %4 : vector<1x16xf32> to vector<16x16xf32>
    %27 = arith.addf %25, %26 : vector<16x16xf32>
    %28 = arith.truncf %27 : vector<16x16xf32> to vector<16x16xbf16>
    %c0_12 = arith.constant 0 : index
    %c0_13 = arith.constant 0 : index
    %c0_14 = arith.constant 0 : index
    %29 = vector.load %arg3[%c0_12, %c0_13, %c0_14] : memref<4x16x16xbf16, #tpu.memory_space<vmem>>, vector<1x16x16xbf16>
    %30 = vector.shape_cast %29 : vector<1x16x16xbf16> to vector<16x16xbf16>
    %cst_15 = arith.constant dense<0.000000e+00> : vector<16x16xf32>
    %31 = tpu.matmul %28, %30, %cst_15 {dimension_numbers = #tpu.dot_dimension_numbers<[1], [0], [0], [1], [0, 0, 1, 1], [], []>} : vector<16x16xbf16>, vector<16x16xbf16>, vector<16x16xf32> -> vector<16x16xf32>
    %c0_16 = arith.constant 0 : index
    %c0_17 = arith.constant 0 : index
    %32 = vector.load %arg6[%c0_16, %c0_17] : memref<16x64xf32, #tpu.memory_space<vmem>>, vector<16x16xf32>
    tpu.vector_store %arg6[%c0_16, %c0_17], %31 {strides = array<i32>} : memref<16x64xf32, #tpu.memory_space<vmem>>, vector<16x16xf32>,
    %33 = vector.extract_strided_slice %2 {offsets = [0, 32], sizes = [16, 16], strides = [1, 1]} : vector<16x64xf32> to vector<16x16xf32>
    %cst_18 = arith.constant dense<0.000000e+00> : vector<16xf32>
    %34 = vector.multi_reduction <add>, %33, %cst_18 [1] : vector<16x16xf32> to vector<16xf32>
    %35 = vector.shape_cast %34 : vector<16xf32> to vector<16x1xf32>
    %cst_19 = arith.constant 1.600000e+01 : f32
    %36 = vector.broadcast %cst_19 : f32 to vector<16x1xf32>
    %37 = arith.divf %35, %36 : vector<16x1xf32>
    %38 = vector.broadcast %37 : vector<16x1xf32> to vector<16x16xf32>
    %39 = arith.subf %33, %38 : vector<16x16xf32>
    %40 = arith.mulf %39, %39 : vector<16x16xf32>
    %cst_20 = arith.constant dense<0.000000e+00> : vector<16xf32>
    %41 = vector.multi_reduction <add>, %40, %cst_20 [1] : vector<16x16xf32> to vector<16xf32>
    %42 = vector.shape_cast %41 : vector<16xf32> to vector<16x1xf32>
    %cst_21 = arith.constant 1.600000e+01 : f32
    %43 = vector.broadcast %cst_21 : f32 to vector<16x1xf32>
    %44 = arith.divf %42, %43 : vector<16x1xf32>
    %45 = vector.broadcast %37 : vector<16x1xf32> to vector<16x16xf32>
    %46 = arith.subf %33, %45 : vector<16x16xf32>
    %cst_22 = arith.constant 9.99999974E-6 : f32
    %47 = vector.broadcast %cst_22 : f32 to vector<16x1xf32>
    %48 = arith.addf %44, %47 : vector<16x1xf32>
    %49 = math.rsqrt %48 : vector<16x1xf32>
    %50 = vector.broadcast %49 : vector<16x1xf32> to vector<16x16xf32>
    %51 = arith.mulf %46, %50 : vector<16x16xf32>
    %52 = vector.broadcast %3 : vector<1x16xf32> to vector<16x16xf32>
    %53 = arith.mulf %51, %52 : vector<16x16xf32>
    %54 = vector.broadcast %4 : vector<1x16xf32> to vector<16x16xf32>
    %55 = arith.addf %53, %54 : vector<16x16xf32>
    %56 = arith.truncf %55 : vector<16x16xf32> to vector<16x16xbf16>
    %c1 = arith.constant 1 : index
    %c0_23 = arith.constant 0 : index
    %c0_24 = arith.constant 0 : index
    %57 = vector.load %arg3[%c1, %c0_23, %c0_24] : memref<4x16x16xbf16, #tpu.memory_space<vmem>>, vector<1x16x16xbf16>
    %58 = vector.shape_cast %57 : vector<1x16x16xbf16> to vector<16x16xbf16>
    %cst_25 = arith.constant dense<0.000000e+00> : vector<16x16xf32>
    %59 = tpu.matmul %56, %58, %cst_25 {dimension_numbers = #tpu.dot_dimension_numbers<[1], [0], [0], [1], [0, 0, 1, 1], [], []>} : vector<16x16xbf16>, vector<16x16xbf16>, vector<16x16xf32> -> vector<16x16xf32>
    %c0_26 = arith.constant 0 : index
    %c16 = arith.constant 16 : index
    %60 = vector.load %arg6[%c0_26, %c16] : memref<16x64xf32, #tpu.memory_space<vmem>>, vector<16x16xf32>
    tpu.vector_store %arg6[%c0_26, %c16], %59 {strides = array<i32>} : memref<16x64xf32, #tpu.memory_space<vmem>>, vector<16x16xf32>,
    %61 = vector.extract_strided_slice %2 {offsets = [0, 16], sizes = [16, 16], strides = [1, 1]} : vector<16x64xf32> to vector<16x16xf32>
    %cst_27 = arith.constant dense<0.000000e+00> : vector<16xf32>
    %62 = vector.multi_reduction <add>, %61, %cst_27 [1] : vector<16x16xf32> to vector<16xf32>
    %63 = vector.shape_cast %62 : vector<16xf32> to vector<16x1xf32>
    %cst_28 = arith.constant 1.600000e+01 : f32
    %64 = vector.broadcast %cst_28 : f32 to vector<16x1xf32>
    %65 = arith.divf %63, %64 : vector<16x1xf32>
    %66 = vector.broadcast %65 : vector<16x1xf32> to vector<16x16xf32>
    %67 = arith.subf %61, %66 : vector<16x16xf32>
    %68 = arith.mulf %67, %67 : vector<16x16xf32>
    %cst_29 = arith.constant dense<0.000000e+00> : vector<16xf32>
    %69 = vector.multi_reduction <add>, %68, %cst_29 [1] : vector<16x16xf32> to vector<16xf32>
    %70 = vector.shape_cast %69 : vector<16xf32> to vector<16x1xf32>
    %cst_30 = arith.constant 1.600000e+01 : f32
    %71 = vector.broadcast %cst_30 : f32 to vector<16x1xf32>
    %72 = arith.divf %70, %71 : vector<16x1xf32>
    %73 = vector.broadcast %65 : vector<16x1xf32> to vector<16x16xf32>
    %74 = arith.subf %61, %73 : vector<16x16xf32>
    %cst_31 = arith.constant 9.99999974E-6 : f32
    %75 = vector.broadcast %cst_31 : f32 to vector<16x1xf32>
    %76 = arith.addf %72, %75 : vector<16x1xf32>
    %77 = math.rsqrt %76 : vector<16x1xf32>
    %78 = vector.broadcast %77 : vector<16x1xf32> to vector<16x16xf32>
    %79 = arith.mulf %74, %78 : vector<16x16xf32>
    %80 = vector.broadcast %3 : vector<1x16xf32> to vector<16x16xf32>
    %81 = arith.mulf %79, %80 : vector<16x16xf32>
    %82 = vector.broadcast %4 : vector<1x16xf32> to vector<16x16xf32>
    %83 = arith.addf %81, %82 : vector<16x16xf32>
    %84 = arith.truncf %83 : vector<16x16xf32> to vector<16x16xbf16>
    %c2 = arith.constant 2 : index
    %c0_32 = arith.constant 0 : index
    %c0_33 = arith.constant 0 : index
    %85 = vector.load %arg3[%c2, %c0_32, %c0_33] : memref<4x16x16xbf16, #tpu.memory_space<vmem>>, vector<1x16x16xbf16>
    %86 = vector.shape_cast %85 : vector<1x16x16xbf16> to vector<16x16xbf16>
    %cst_34 = arith.constant dense<0.000000e+00> : vector<16x16xf32>
    %87 = tpu.matmul %84, %86, %cst_34 {dimension_numbers = #tpu.dot_dimension_numbers<[1], [0], [0], [1], [0, 0, 1, 1], [], []>} : vector<16x16xbf16>, vector<16x16xbf16>, vector<16x16xf32> -> vector<16x16xf32>
    %c0_35 = arith.constant 0 : index
    %c32 = arith.constant 32 : index
    %88 = vector.load %arg6[%c0_35, %c32] : memref<16x64xf32, #tpu.memory_space<vmem>>, vector<16x16xf32>
    tpu.vector_store %arg6[%c0_35, %c32], %87 {strides = array<i32>} : memref<16x64xf32, #tpu.memory_space<vmem>>, vector<16x16xf32>,
    %89 = vector.extract_strided_slice %2 {offsets = [0, 48], sizes = [16, 16], strides = [1, 1]} : vector<16x64xf32> to vector<16x16xf32>
    %cst_36 = arith.constant dense<0.000000e+00> : vector<16xf32>
    %90 = vector.multi_reduction <add>, %89, %cst_36 [1] : vector<16x16xf32> to vector<16xf32>
    %91 = vector.shape_cast %90 : vector<16xf32> to vector<16x1xf32>
    %cst_37 = arith.constant 1.600000e+01 : f32
    %92 = vector.broadcast %cst_37 : f32 to vector<16x1xf32>
    %93 = arith.divf %91, %92 : vector<16x1xf32>
    %94 = vector.broadcast %93 : vector<16x1xf32> to vector<16x16xf32>
    %95 = arith.subf %89, %94 : vector<16x16xf32>
    %96 = arith.mulf %95, %95 : vector<16x16xf32>
    %cst_38 = arith.constant dense<0.000000e+00> : vector<16xf32>
    %97 = vector.multi_reduction <add>, %96, %cst_38 [1] : vector<16x16xf32> to vector<16xf32>
    %98 = vector.shape_cast %97 : vector<16xf32> to vector<16x1xf32>
    %cst_39 = arith.constant 1.600000e+01 : f32
    %99 = vector.broadcast %cst_39 : f32 to vector<16x1xf32>
    %100 = arith.divf %98, %99 : vector<16x1xf32>
    %101 = vector.broadcast %93 : vector<16x1xf32> to vector<16x16xf32>
    %102 = arith.subf %89, %101 : vector<16x16xf32>
    %cst_40 = arith.constant 9.99999974E-6 : f32
    %103 = vector.broadcast %cst_40 : f32 to vector<16x1xf32>
    %104 = arith.addf %100, %103 : vector<16x1xf32>
    %105 = math.rsqrt %104 : vector<16x1xf32>
    %106 = vector.broadcast %105 : vector<16x1xf32> to vector<16x16xf32>
    %107 = arith.mulf %102, %106 : vector<16x16xf32>
    %108 = vector.broadcast %3 : vector<1x16xf32> to vector<16x16xf32>
    %109 = arith.mulf %107, %108 : vector<16x16xf32>
    %110 = vector.broadcast %4 : vector<1x16xf32> to vector<16x16xf32>
    %111 = arith.addf %109, %110 : vector<16x16xf32>
    %112 = arith.truncf %111 : vector<16x16xf32> to vector<16x16xbf16>
    %c3 = arith.constant 3 : index
    %c0_41 = arith.constant 0 : index
    %c0_42 = arith.constant 0 : index
    %113 = vector.load %arg3[%c3, %c0_41, %c0_42] : memref<4x16x16xbf16, #tpu.memory_space<vmem>>, vector<1x16x16xbf16>
    %114 = vector.shape_cast %113 : vector<1x16x16xbf16> to vector<16x16xbf16>
    %cst_43 = arith.constant dense<0.000000e+00> : vector<16x16xf32>
    %115 = tpu.matmul %112, %114, %cst_43 {dimension_numbers = #tpu.dot_dimension_numbers<[1], [0], [0], [1], [0, 0, 1, 1], [], []>} : vector<16x16xbf16>, vector<16x16xbf16>, vector<16x16xf32> -> vector<16x16xf32>
    %c0_44 = arith.constant 0 : index
    %c48 = arith.constant 48 : index
    %116 = vector.load %arg6[%c0_44, %c48] : memref<16x64xf32, #tpu.memory_space<vmem>>, vector<16x16xf32>
    tpu.vector_store %arg6[%c0_44, %c48], %115 {strides = array<i32>} : memref<16x64xf32, #tpu.memory_space<vmem>>, vector<16x16xf32>,
    return
  }
  func.func @transform_0(%arg0: i32) -> (i32, i32) {
    %c0_i32 = arith.constant 0 : i32
    %c0_i32_0 = arith.constant 0 : i32
    return %arg0, %c0_i32 : i32, i32
  }
  func.func @transform_1(%arg0: i32) -> (i32, i32) {
    %c0_i32 = arith.constant 0 : i32
    %c0_i32_0 = arith.constant 0 : i32
    %c0_i32_1 = arith.constant 0 : i32
    return %c0_i32, %c0_i32_0 : i32, i32
  }
  func.func @transform_2(%arg0: i32) -> (i32, i32, i32) {
    %c0_i32 = arith.constant 0 : i32
    %c0_i32_0 = arith.constant 0 : i32
    %c0_i32_1 = arith.constant 0 : i32
    %c0_i32_2 = arith.constant 0 : i32
    return %c0_i32, %c0_i32_0, %c0_i32_1 : i32, i32, i32
  }
  func.func @transform_3(%arg0: i32) -> (i32, i32) {
    %c0_i32 = arith.constant 0 : i32
    %c0_i32_0 = arith.constant 0 : i32
    %c0_i32_1 = arith.constant 0 : i32
    return %c0_i32, %c0_i32_0 : i32, i32
  }
  func.func @transform_4(%arg0: i32) -> (i32, i32) {
    %c0_i32 = arith.constant 0 : i32
    %c0_i32_0 = arith.constant 0 : i32
    %c0_i32_1 = arith.constant 0 : i32
    return %c0_i32, %c0_i32_0 : i32, i32
  }
  func.func @transform_5(%arg0: i32) -> (i32, i32) {
    %c0_i32 = arith.constant 0 : i32
    %c0_i32_0 = arith.constant 0 : i32
    return %arg0, %c0_i32 : i32, i32
  }
}

</mosaic_0001>

<bundles_post_ra>
// kernel: tpu_custom_call.1
= control target key start
LH: loop header
LB: loop body
LE: loop exit
PB: predicated region body
PF: predicated region fallthrough
CT: control target
= control target key end

     0   :  { %10 = vsyncpa [#allocation3], 0  ;;  %s1151_s0 = inlined_call_operand.hbm [shape: bf16[16,32], index: 0, kind: input, shape index: {}]   ;;  %s1152_s1 = inlined_call_operand.hbm [shape: bf16[32,64], index: 1, kind: input, shape index: {}]   ;;  %s1153_s2 = inlined_call_operand.hbm [shape: bf16[4,16,16], index: 2, kind: input, shape index: {}]   ;;  %s1154_s3 = inlined_call_operand.hbm [shape: f32[1,16], index: 3, kind: input, shape index: {}]   ;;  %s1155_s4 = inlined_call_operand.hbm [shape: f32[1,16], index: 4, kind: input, shape index: {}]   ;;  %s1156_s5 = inlined_call_operand.hbm [shape: f32[16,64], index: 5, kind: output, shape index: {}]  }
   0x1   :  { %11 = vsyncpa [#allocation6], 0 }
   0x2   :  { %12 = vsyncpa [#allocation9], 0 }
   0x3   :  { %13 = vsyncpa [#allocation4], 0  ;;  %s868_s18 = smov [#allocation5]   ;;  %s869_s20 = smov [#allocation8]  }
   0x4   :  { %s31_s19 = sshll.u32 %s868_s18, 4  ;;  %s56_s21 = sshll.u32 %s869_s20, 4  ;;  %s32_s19 = int_to_ptr.vmem [resolvable:$true] %s31_s19  ;;  %s916_s21 = int_to_ptr.vmem [resolvable:$true] %s56_s21 }
   0x5   :  { %s728_s24 = scalar_lea.hbm %s1152_s1, 256 }
   0x6   :  { %p729_p0 = scmp.ne.s32.totalorder %s1152_s1, %s728_s24  ;;  %p732_p1 = scmp.lt.u32.totalorder %s728_s24, %s1152_s1 }
   0x8   :  { %p734_p2 = pnand %p732_p1, %p729_p0 }
   0xa   :  { %737 = shalt.err (!%p734_p2)
}
   0xb   :  { %s738_s29 = scalar_lea.vmem %s32_s19, 256  ;;  %p743_p4 = scmp.lt.s32.totalorder %s32_s19, %s32_s19 }
   0xc   :  { %p739_p3 = scmp.ne.s32.totalorder %s32_s19, %s738_s29  ;;  %p744_p5 = scmp.lt.s32.totalorder %s738_s29, %s738_s29 }
   0xe   :  { %p745_p6 = por %p744_p5, %p743_p4 }
  0x10   :  { %p746_p7 = pnand %p745_p6, %p739_p3 }
  0x12   :  { %749 = shalt.err (!%p746_p7)
}
  0x13   :  { %s870_s30 = smov 64   ;;  %s871_s6 = smov 4  }
  0x14   :  { %37 = dma.hbm_to_vmem [thread:$0]  %s1152_s1, 256, %s32_s19, [#allocation6], %s870_s30, %s870_s30, %s871_s6  }
  0x15   :  { %s750_s11 = scalar_lea.hbm %s1154_s3, 16 }
  0x16   :  { %p751_p8 = scmp.ne.s32.totalorder %s1154_s3, %s750_s11  ;;  %p754_p9 = scmp.lt.u32.totalorder %s750_s11, %s1154_s3 }
  0x18   :  { %p756_p10 = pnand %p754_p9, %p751_p8 }
  0x1a   :  { %759 = shalt.err (!%p756_p10)
}
  0x1b   :  { %s760_s16 = scalar_lea.vmem %s916_s21, 16  ;;  %s764_s1 = scalar_lea.vmem %s916_s21, 32 }
  0x1c   :  { %p761_p11 = scmp.ne.s32.totalorder %s916_s21, %s760_s16  ;;  %p765_p12 = scmp.lt.s32.totalorder %s916_s21, %s916_s21 }
  0x1d   :  { %p766_p13 = scmp.lt.s32.totalorder %s764_s1, %s760_s16 }
  0x1f   :  { %p767_p0 = por %p766_p13, %p765_p12 }
  0x21   :  { %p768_p1 = pnand %p767_p0, %p761_p11 }
  0x23   :  { %771 = shalt.err (!%p768_p1)
}
  0x24   :  { %59 = dma.hbm_to_vmem [thread:$0]  %s1154_s3, 16, %s916_s21, [#allocation9]  }
  0x25   :  { %s872_s19 = smov [#allocation2]   ;;  %s873_s22 = smov [#allocation7]  }
  0x26   :  { %s19_s20 = sshll.u32 %s872_s19, 4  ;;  %s43_s23 = sshll.u32 %s873_s22, 4  ;;  %s20_s20 = int_to_ptr.vmem [resolvable:$true] %s19_s20  ;;  %s951_s23 = int_to_ptr.vmem [resolvable:$true] %s43_s23 }
  0x27   :  { %s772_s26 = scalar_lea.hbm %s1151_s0, 128 }
  0x28   :  { %p773_p2 = scmp.ne.s32.totalorder %s1151_s0, %s772_s26  ;;  %p776_p3 = scmp.lt.u32.totalorder %s772_s26, %s1151_s0 }
  0x2a   :  { %p778_p4 = pnand %p776_p3, %p773_p2 }
  0x2c   :  { %781 = shalt.err (!%p778_p4)
}
  0x2d   :  { %s782_s3 = scalar_lea.vmem %s20_s20, 128  ;;  %p787_p6 = scmp.lt.s32.totalorder %s20_s20, %s20_s20 }
  0x2e   :  { %p783_p5 = scmp.ne.s32.totalorder %s20_s20, %s782_s3  ;;  %p788_p7 = scmp.lt.s32.totalorder %s782_s3, %s782_s3 }
  0x30   :  { %p789_p8 = por %p788_p7, %p787_p6 }
  0x32   :  { %p790_p9 = pnand %p789_p8, %p783_p5 }
  0x34   :  { %793 = shalt.err (!%p790_p9)
}
  0x35   :  { %25 = dma.hbm_to_vmem [thread:$0]  %s1151_s0, 128, %s20_s20, [#allocation3], %s870_s30, %s870_s30, %s871_s6  }
  0x36   :  { %s794_s11 = scalar_lea.hbm %s1153_s2, 512 }
  0x37   :  { %p795_p10 = scmp.ne.s32.totalorder %s1153_s2, %s794_s11  ;;  %p798_p11 = scmp.lt.u32.totalorder %s794_s11, %s1153_s2 }
  0x39   :  { %p800_p12 = pnand %p798_p11, %p795_p10 }
  0x3b   :  { %803 = shalt.err (!%p800_p12)
}
  0x3c   :  { %s804_s16 = scalar_lea.vmem %s951_s23, 512  ;;  %p809_p0 = scmp.lt.s32.totalorder %s951_s23, %s951_s23 }
  0x3d   :  { %p805_p13 = scmp.ne.s32.totalorder %s951_s23, %s804_s16  ;;  %p810_p1 = scmp.lt.s32.totalorder %s804_s16, %s804_s16 }
  0x3f   :  { %p811_p2 = por %p810_p1, %p809_p0 }
  0x41   :  { %p812_p3 = pnand %p811_p2, %p805_p13 }
  0x43   :  { %815 = shalt.err (!%p812_p3)
}
  0x44   :  { %49 = dma.hbm_to_vmem [thread:$0]  %s1153_s2, 512, %s951_s23, [#allocation6], %s870_s30, %s870_s30, %s871_s6  }
  0x45   :  { %s874_s17 = smov [#allocation10]   ;;  %s816_s22 = scalar_lea.hbm %s1155_s4, 16 }
  0x46   :  { %s66_s18 = sshll.u32 %s874_s17, 4  ;;  %p817_p4 = scmp.ne.s32.totalorder %s1155_s4, %s816_s22  ;;  %s67_s18 = int_to_ptr.vmem [resolvable:$true] %s66_s18 }
  0x47   :  { %p820_p5 = scmp.lt.u32.totalorder %s816_s22, %s1155_s4 }
  0x49   :  { %p822_p6 = pnand %p820_p5, %p817_p4 }
  0x4b   :  { %825 = shalt.err (!%p822_p6)
}
  0x4c   :  { %s826_s28 = scalar_lea.vmem %s67_s18, 16  ;;  %s830_s2 = scalar_lea.vmem %s67_s18, 32 }
  0x4d   :  { %p827_p7 = scmp.ne.s32.totalorder %s67_s18, %s826_s28  ;;  %p831_p8 = scmp.lt.s32.totalorder %s67_s18, %s67_s18 }
  0x4e   :  { %p832_p9 = scmp.lt.s32.totalorder %s830_s2, %s826_s28 }
  0x50   :  { %p833_p10 = por %p832_p9, %p831_p8 }
  0x52   :  { %p834_p11 = pnand %p833_p10, %p827_p7 }
  0x54   :  { %837 = shalt.err (!%p834_p11)
}
  0x55   :  { %69 = dma.hbm_to_vmem [thread:$0]  %s1155_s4, 16, %s67_s18, [#allocation9]  }
  0x56   :  { %860 = dma.done.wait [#allocation3], 128  }
  0x57   :  { %861 = vsyncadd [#allocation3], 4294967168 }
  0x58   :  { %862 = dma.done.wait [#allocation6], 768  }
  0x59   :  { %863 = vsyncadd [#allocation6], 4294966528 }
  0x5a   :  { %864 = dma.done.wait [#allocation9], 32  }
  0x5b   :  { %865 = vsyncadd [#allocation9], 4294967264  ;;  %v875_v0 = vmov 0.0   ;;  %vm876_vm0 = vmmov 0   ;;  %v705_v1 = vld [vmem:[#allocation5] sm:$0xff]   ;;  %v706_v2 = vld [vmem:[#allocation5 + $0x8] sm:$0xff]  }
  0x5c   :  { %655 = vmatprep.subr.bf16.mxu0 %v875_v0  ;;  %659 = vmatprep.mubr.msk.bf16.mxu0 %vm876_vm0, %v875_v0  ;;  %v707_v3 = vld [vmem:[#allocation2] sm:$0xff]   ;;  %vm109_vm1 = vcmask 261120   ;;  %s877_s4 = smov 112   ;;  %s878_s23 = smov 96   ;;  %vm156_vm2 = vcmask 130048   ;;  %vm372_vm3 = vcmask 261248  }
  0x5d   :  { %663 = vmatprep.subr.bf16.mxu1 %v875_v0  ;;  %665 = vmatprep.mubr.msk.bf16.mxu1 %vm876_vm0, %v875_v0  ;;  %s879_s29 = smov 80   ;;  %v1072_v46 = vld [vmem:[#allocation8] ss:$0 sm:$0xff]  ;;  %v1074_v47 = vld [vmem:[#allocation10] ss:$0 sm:$0xff]  ;;  %s880_s7 = smov 32  }
  0x5e   :  { %656 = vmatpush3.bf16.msra.mxu0 %v705_v1  ;;  %s881_s3 = smov 16   ;;  %s882_s21 = smov 48   ;;  %vm490_vm4 = vcmask 392448   ;;  %vm608_vm5 = vcmask 523648  }
  0x5f   :  { %657 = vmatprep.subr.bf16.mxu0 %v875_v0  ;;  %s883_s8 = smov [#allocation11]  }
  0x60   :  { %s616_s9 = sshll.u32 %s883_s8, 4  ;;  %s617_s9 = int_to_ptr.vmem [resolvable:$true] %s616_s9 }
  0x61   :  { %s838_s10 = scalar_lea.vmem %s617_s9, 256  ;;  %p843_p13 = scmp.lt.s32.totalorder %s617_s9, %s617_s9 }
  0x62   :  { %658 = vmatpush3.bf16.msra.mxu0 %v706_v2  ;;  %p839_p12 = scmp.ne.s32.totalorder %s617_s9, %s838_s10  ;;  %p844_p0 = scmp.lt.s32.totalorder %s838_s10, %s838_s10 }
  0x63   :  { %675 = vmatprep.subr.bf16.mxu0 %v875_v0 }
  0x64   :  { %p845_p1 = por %p844_p0, %p843_p13 }
  0x65   :  { %660 = vmatmul.mubr.msk.bf16.vlgmr.msra.gmra.mrb[0].mxu0 %vm109_vm1, %v707_v3 }
  0x66   :  { %677 = vmatprep.mubr.msk.bf16.mxu0 %vm876_vm0, %v875_v0  ;;  %p846_p2 = pnand %p845_p1, %p839_p12 }
 0x138   :  { %v1010_v4 = vpop.f32.mrb[0].mxu0 }
 0x139   :  { %375 = vrot.lane.b32.xlu1 %v1010_v4, %s877_s4  ;;  %257 = vrot.lane.b32.xlu0 %v1010_v4, %s878_s23  ;;  %v661_v5 = vpop.f32.mrb[1].mxu0  ;;  %v157_v44 = vsel %vm156_vm2, %v1010_v4, 0.0 }
 0x13a   :  { %v1016_v6 = vpop.f32.mrb[2].mxu0 }
 0x13b   :  { %v662_v7 = vpop.f32.mrb[3].mxu0  ;;  %v160_v45 = vsel %vm156_vm2, %v1016_v6, 0.0 }
 0x13d   :  { %377 = vrot.lane.b32.xlu1 %v1016_v6, %s877_s4  ;;  %259 = vrot.lane.b32.xlu0 %v1016_v6, %s878_s23 }
 0x141   :  { %495 = vrot.lane.b32.xlu1 %v1016_v6, %s879_s29  ;;  %493 = vrot.lane.b32.xlu0 %v1010_v4, %s879_s29 }
 0x1ab   :  { %v376_v8 = vpop.permute.xlu1 %375  ;;  %v258_v9 = vpop.permute.xlu0 %257 }
 0x1ac   :  { %v263_v10 = vsel %vm156_vm2, %v258_v9, 0.0  ;;  %v381_v13 = vsel %vm156_vm2, %v376_v8, 0.0  ;;  %v708_v9 = vld [vmem:[#allocation7] sm:$0xff]  }
 0x1ad   :  { %264 = vadd.xlane.f32.xlu0 %v263_v10  ;;  %664 = vmatpush3.bf16.msra.mxu1 %v708_v9 }
 0x1ae   :  { %669 = vmatprep.subr.bf16.mxu1 %v875_v0 }
 0x1af   :  { %v378_v11 = vpop.permute.xlu1 %377  ;;  %v260_v12 = vpop.permute.xlu0 %259 }
 0x1b0   :  { %v266_v14 = vsel %vm156_vm2, %v260_v12, 0.0  ;;  %v384_v16 = vsel %vm156_vm2, %v378_v11, 0.0 }
 0x1b1   :  { %382 = vadd.xlane.f32.xlu0 %v381_v13  ;;  %267 = vadd.xlane.f32.xlu1 %v266_v14 }
 0x1b3   :  { %v494_v15 = vpop.permute.xlu0 %493  ;;  %v496_v18 = vpop.permute.xlu1 %495 }
 0x1b4   :  { %v499_v17 = vsel %vm156_vm2, %v494_v15, 0.0  ;;  %v502_v19 = vsel %vm156_vm2, %v496_v18, 0.0 }
 0x1b5   :  { %385 = vadd.xlane.f32.xlu0 %v384_v16  ;;  %500 = vadd.xlane.f32.xlu1 %v499_v17 }
 0x1b9   :  { %503 = vadd.xlane.f32.xlu0 %v502_v19 }
 0x23a   :  { %v265_v20 = vpop.xlane.xlu0 %264 }
 0x23b   :  { %v269_v21 = vmul.f32 0.0625, %v265_v20 }
 0x23d   :  { %v1033_v22 = vsub.f32 %v1010_v4, %v269_v21 }
 0x23e   :  { %v268_v23 = vpop.xlane.xlu1 %267  ;;  %v383_v24 = vpop.xlane.xlu0 %382 }
 0x23f   :  { %v387_v25 = vmul.f32 0.0625, %v383_v24  ;;  %v273_v26 = vmul.f32 %v1033_v22, %v1033_v22  ;;  %v270_v30 = vmul.f32 0.0625, %v268_v23 }
 0x241   :  { %v1038_v27 = vsub.f32 %v1010_v4, %v387_v25  ;;  %277 = vrot.lane.b32.xlu1 %v273_v26, %s878_s23  ;;  %v1051_v37 = vsub.f32 %v1016_v6, %v270_v30 }
 0x242   :  { %v501_v28 = vpop.xlane.xlu1 %500  ;;  %v386_v29 = vpop.xlane.xlu0 %385 }
 0x243   :  { %v505_v31 = vmul.f32 0.0625, %v501_v28  ;;  %v388_v32 = vmul.f32 0.0625, %v386_v29  ;;  %v391_v33 = vmul.f32 %v1038_v27, %v1038_v27  ;;  %v274_v42 = vmul.f32 %v1051_v37, %v1051_v37 }
 0x245   :  { %v1044_v34 = vsub.f32 %v1010_v4, %v505_v31  ;;  %v1047_v35 = vsub.f32 %v1016_v6, %v388_v32  ;;  %395 = vrot.lane.b32.xlu1 %v391_v33, %s877_s4 }
 0x246   :  { %v504_v36 = vpop.xlane.xlu0 %503 }
 0x247   :  { %v506_v38 = vmul.f32 0.0625, %v504_v36  ;;  %v509_v39 = vmul.f32 %v1044_v34, %v1044_v34  ;;  %v392_v40 = vmul.f32 %v1047_v35, %v1047_v35 }
 0x249   :  { %v1058_v41 = vsub.f32 %v1016_v6, %v506_v38  ;;  %513 = vrot.lane.b32.xlu0 %v509_v39, %s879_s29  ;;  %397 = vrot.lane.b32.xlu1 %v392_v40, %s877_s4 }
 0x24b   :  { %v510_v43 = vmul.f32 %v1058_v41, %v1058_v41 }
 0x24d   :  { %279 = vrot.lane.b32.xlu0 %v274_v42, %s878_s23  ;;  %515 = vrot.lane.b32.xlu1 %v510_v43, %s879_s29 }
 0x26c   :  { %158 = vadd.xlane.f32.xlu0 %v157_v44 }
 0x271   :  { %161 = vadd.xlane.f32.xlu1 %v160_v45 }
 0x282   :  { %297 = vrot.lane.b32.xlu1 %v1072_v46, %s880_s7  ;;  %302 = vrot.lane.b32.xlu0 %v1074_v47, %s880_s7 }
 0x286   :  { %415 = vrot.lane.b32.xlu1 %v1072_v46, %s881_s3 }
 0x28a   :  { %533 = vrot.lane.b32.xlu1 %v1072_v46, %s882_s21 }
 0x2b3   :  { %v278_v48 = vpop.permute.xlu1 %277 }
 0x2b4   :  { %v283_v49 = vsel %vm156_vm2, %v278_v48, 0.0 }
 0x2b5   :  { %284 = vadd.xlane.f32.xlu0 %v283_v49 }
 0x2b7   :  { %v396_v50 = vpop.permute.xlu1 %395 }
 0x2b8   :  { %v401_v51 = vsel %vm156_vm2, %v396_v50, 0.0 }
 0x2b9   :  { %402 = vadd.xlane.f32.xlu1 %v401_v51 }
 0x2bb   :  { %v514_v52 = vpop.permute.xlu0 %513  ;;  %v398_v54 = vpop.permute.xlu1 %397 }
 0x2bc   :  { %v519_v53 = vsel %vm156_vm2, %v514_v52, 0.0  ;;  %v404_v57 = vsel %vm156_vm2, %v398_v54, 0.0 }
 0x2bd   :  { %520 = vadd.xlane.f32.xlu1 %v519_v53 }
 0x2bf   :  { %v280_v55 = vpop.permute.xlu0 %279  ;;  %v516_v58 = vpop.permute.xlu1 %515 }
 0x2c0   :  { %v286_v56 = vsel %vm156_vm2, %v280_v55, 0.0  ;;  %v522_v59 = vsel %vm156_vm2, %v516_v58, 0.0 }
 0x2c1   :  { %287 = vadd.xlane.f32.xlu0 %v286_v56 }
 0x2c5   :  { %405 = vadd.xlane.f32.xlu0 %v404_v57 }
 0x2c9   :  { %523 = vadd.xlane.f32.xlu0 %v522_v59 }
 0x2ce   :  { %538 = vrot.lane.b32.xlu1 %v1074_v47, %s882_s21 }
 0x2df   :  { %420 = vrot.lane.b32.xlu0 %v1074_v47, %s881_s3 }
 0x2f9   :  { %v159_v60 = vpop.xlane.xlu0 %158 }
 0x2fa   :  { %v164_v61 = vmul.f32 0.0625, %v159_v60 }
 0x2fc   :  { %v1095_v62 = vsub.f32 %v1010_v4, %v164_v61  ;;  %v710_v4 = vld [vmem:[#allocation7 + $0x10] sm:$0xff]  }
 0x2fd   :  { %676 = vmatpush3.bf16.msra.mxu0 %v710_v4  ;;  %v303_v12 = vpop.permute.xlu0 %302 }
 0x2fe   :  { %v162_v63 = vpop.xlane.xlu1 %161  ;;  %v168_v1 = vmul.f32 %v1095_v62, %v1095_v62 }
 0x2ff   :  { %v165_v2 = vmul.f32 0.0625, %v162_v63 }
 0x300   :  { %v170_v3 = vsel %vm156_vm2, %v168_v1, 0.0 }
 0x301   :  { %v1101_v5 = vsub.f32 %v1016_v6, %v165_v2  ;;  %171 = vadd.xlane.f32.xlu0 %v170_v3 }
 0x302   :  { %v298_v10 = vpop.permute.xlu1 %297 }
 0x303   :  { %v169_v7 = vmul.f32 %v1101_v5, %v1101_v5 }
 0x305   :  { %v173_v8 = vsel %vm156_vm2, %v169_v7, 0.0 }
 0x306   :  { %174 = vadd.xlane.f32.xlu1 %v173_v8  ;;  %v416_v11 = vpop.permute.xlu1 %415 }
 0x30a   :  { %v534_v13 = vpop.permute.xlu1 %533 }
 0x342   :  { %v285_v14 = vpop.xlane.xlu0 %284 }
 0x343   :  { %v289_v6 = vmul.f32 0.0625, %v285_v14 }
 0x345   :  { %v291_v16 = vadd.f32 1e-05, %v289_v6 }
 0x346   :  { %v403_v15 = vpop.xlane.xlu1 %402 }
 0x347   :  { %v407_v17 = vmul.f32 0.0625, %v403_v15  ;;  %712 = vrsqrt.f32 %v291_v16  ;;  %v709_v15 = vld [vmem:[#allocation7 + $0x8] sm:$0xff]  }
 0x349   :  { %v409_v19 = vadd.f32 1e-05, %v407_v17 }
 0x34a   :  { %v521_v18 = vpop.xlane.xlu1 %520 }
 0x34b   :  { %v525_v20 = vmul.f32 0.0625, %v521_v18  ;;  %714 = vrsqrt.f32 %v409_v19 }
 0x34d   :  { %v527_v24 = vadd.f32 1e-05, %v525_v20 }
 0x34e   :  { %v288_v21 = vpop.xlane.xlu0 %287 }
 0x34f   :  { %v290_v23 = vmul.f32 0.0625, %v288_v21 }
 0x351   :  { %v292_v25 = vadd.f32 1e-05, %v290_v23  ;;  %v713_v30 = vpop.eup %712 }
 0x352   :  { %v406_v26 = vpop.xlane.xlu0 %405  ;;  %v295_v36 = vmul.f32 %v713_v30, %v1033_v22 }
 0x353   :  { %716 = vrsqrt.f32 %v292_v25  ;;  %v408_v28 = vmul.f32 0.0625, %v406_v26 }
 0x354   :  { %718 = vrsqrt.f32 %v527_v24  ;;  %v300_v40 = vmul.f32 %v298_v10, %v295_v36 }
 0x355   :  { %v410_v29 = vadd.f32 1e-05, %v408_v28  ;;  %v715_v38 = vpop.eup %714 }
 0x356   :  { %v524_v31 = vpop.xlane.xlu0 %523  ;;  %v413_v42 = vmul.f32 %v715_v38, %v1038_v27  ;;  %v305_v49 = vadd.f32 %v303_v12, %v300_v40 }
 0x357   :  { %720 = vrsqrt.f32 %v410_v29  ;;  %v526_v32 = vmul.f32 0.0625, %v524_v31 }
 0x358   :  { %v418_v51 = vmul.f32 %v416_v11, %v413_v42 }
 0x359   :  { %v528_v33 = vadd.f32 1e-05, %v526_v32 }
 0x35a   :  { %v421_v54 = vpop.permute.xlu0 %420 }
 0x35b   :  { %722 = vrsqrt.f32 %v528_v33  ;;  %v423_v57 = vadd.f32 %v421_v54, %v418_v51 }
 0x35d   :  { %v717_v39 = vpop.eup %716 }
 0x35e   :  { %v296_v43 = vmul.f32 %v717_v39, %v1051_v37  ;;  %v719_v44 = vpop.eup %718  ;;  %v539_v37 = vpop.permute.xlu1 %538 }
 0x35f   :  { %v531_v52 = vmul.f32 %v719_v44, %v1044_v34 }
 0x360   :  { %v301_v45 = vmul.f32 %v298_v10, %v296_v43 }
 0x361   :  { %v721_v48 = vpop.eup %720  ;;  %v536_v59 = vmul.f32 %v534_v13, %v531_v52 }
 0x362   :  { %v414_v50 = vmul.f32 %v721_v48, %v1047_v35  ;;  %v306_v53 = vadd.f32 %v303_v12, %v301_v45 }
 0x363   :  { %v541_v63 = vadd.f32 %v539_v37, %v536_v59 }
 0x364   :  { %v419_v22 = vmul.f32 %v416_v11, %v414_v50  ;;  %v307_v55 = vpack.c.bf16 %v306_v53, %v305_v49 }
 0x365   :  { %v723_v56 = vpop.eup %722 }
 0x366   :  { %v424_v58 = vadd.f32 %v421_v54, %v419_v22  ;;  %v532_v27 = vmul.f32 %v723_v56, %v1058_v41  ;;  %312 = vrot.lane.b32.xlu0 %v307_v55, %s878_s23 }
 0x368   :  { %v425_v60 = vpack.c.bf16 %v424_v58, %v423_v57  ;;  %v537_v61 = vmul.f32 %v534_v13, %v532_v27 }
 0x36a   :  { %v542_v35 = vadd.f32 %v539_v37, %v537_v61  ;;  %430 = vrot.lane.b32.xlu1 %v425_v60, %s877_s4 }
 0x36c   :  { %v543_v34 = vpack.c.bf16 %v542_v35, %v541_v63 }
 0x36e   :  { %548 = vrot.lane.b32.xlu0 %v543_v34, %s879_s29 }
 0x38e   :  { %v172_v1 = vpop.xlane.xlu0 %171 }
 0x38f   :  { %v176_v2 = vmul.f32 0.0625, %v172_v1 }
 0x391   :  { %v178_v3 = vadd.f32 1e-05, %v176_v2 }
 0x393   :  { %724 = vrsqrt.f32 %v178_v3  ;;  %v175_v7 = vpop.xlane.xlu1 %174 }
 0x394   :  { %v177_v8 = vmul.f32 0.0625, %v175_v7 }
 0x396   :  { %v179_v41 = vadd.f32 1e-05, %v177_v8 }
 0x398   :  { %726 = vrsqrt.f32 %v179_v41 }
 0x39d   :  { %v725_v9 = vpop.eup %724 }
 0x39e   :  { %v182_v4 = vmul.f32 %v725_v9, %v1095_v62  ;;  %v711_v62 = vld [vmem:[#allocation7 + $0x18] sm:$0xff]  }
 0x3a0   :  { %v190_v12 = vmul.f32 %v1072_v46, %v182_v4 }
 0x3a2   :  { %v727_v10 = vpop.eup %726  ;;  %v198_v14 = vadd.f32 %v1074_v47, %v190_v12 }
 0x3a3   :  { %v183_v11 = vmul.f32 %v727_v10, %v1101_v5 }
 0x3a5   :  { %v191_v13 = vmul.f32 %v1072_v46, %v183_v11 }
 0x3a7   :  { %v199_v6 = vadd.f32 %v1074_v47, %v191_v13 }
 0x3a9   :  { %v200_v16 = vpack.c.bf16 %v199_v6, %v198_v14 }
 0x3ab   :  { %666 = vmatmul.mubr.msk.bf16.vlgmr.msra.gmra.mrb[0].mxu1 %vm156_vm2, %v200_v16 }
 0x3ac   :  { %670 = vmatpush3.bf16.msra.mxu1 %v709_v15  ;;  %671 = vmatprep.mubr.msk.bf16.mxu1 %vm876_vm0, %v875_v0 }
 0x3ad   :  { %681 = vmatprep.subr.bf16.mxu1 %v875_v0 }
 0x3d8   :  { %v313_v5 = vpop.permute.xlu0 %312 }
 0x3d9   :  { %672 = vmatmul.mubr.msk.bf16.vlgmr.msra.gmra.mrb[4].mxu1 %vm156_vm2, %v313_v5 }
 0x3da   :  { %682 = vmatpush3.bf16.msra.mxu1 %v711_v62  ;;  %683 = vmatprep.mubr.msk.bf16.mxu1 %vm876_vm0, %v875_v0 }
 0x3dc   :  { %v431_v46 = vpop.permute.xlu1 %430 }
 0x3dd   :  { %678 = vmatmul.mubr.msk.bf16.vlgmr.msra.gmra.mrb[4].mxu0 %vm156_vm2, %v431_v46 }
 0x3e0   :  { %v549_v47 = vpop.permute.xlu0 %548 }
 0x3e1   :  { %684 = vmatmul.mubr.msk.bf16.vlgmr.msra.gmra.mrb[8].mxu1 %vm156_vm2, %v549_v47 }
 0x47e   :  { %v246_v17 = vpop.f32.mrb[0].mxu1 }
 0x47f   :  { %253 = vst.msk [vmem:[#allocation11] sm:$0xff] %vm156_vm2, %v246_v17  ;;  %v667_v18 = vpop.f32.mrb[1].mxu1 }
 0x480   :  { %v249_v19 = vpop.f32.mrb[2].mxu1 }
 0x481   :  { %254 = vst.msk [vmem:[#allocation11 + $0x8] sm:$0xff] %vm156_vm2, %v249_v19  ;;  %v668_v20 = vpop.f32.mrb[3].mxu1 }
 0x4ac   :  { %v357_v21 = vpop.f32.mrb[4].mxu1 }
 0x4ad   :  { %366 = vrot.lane.b32.xlu1 %v357_v21, %s881_s3  ;;  %v673_v23 = vpop.f32.mrb[5].mxu1 }
 0x4ae   :  { %v360_v24 = vpop.f32.mrb[6].mxu1 }
 0x4af   :  { %368 = vrot.lane.b32.xlu0 %v360_v24, %s881_s3  ;;  %v674_v0 = vpop.f32.mrb[7].mxu1 }
 0x4b0   :  { %v475_v25 = vpop.f32.mrb[4].mxu0 }
 0x4b1   :  { %484 = vrot.lane.b32.xlu1 %v475_v25, %s880_s7  ;;  %v679_v26 = vpop.f32.mrb[5].mxu0 }
 0x4b2   :  { %v478_v28 = vpop.f32.mrb[6].mxu0 }
 0x4b3   :  { %486 = vrot.lane.b32.xlu0 %v478_v28, %s880_s7  ;;  %v680_v29 = vpop.f32.mrb[7].mxu0 }
 0x4b4   :  { %v593_v30 = vpop.f32.mrb[8].mxu1 }
 0x4b5   :  { %v685_v31 = vpop.f32.mrb[9].mxu1  ;;  %602 = vrot.lane.b32.xlu1 %v593_v30, %s882_s21 }
 0x4b6   :  { %v596_v32 = vpop.f32.mrb[10].mxu1 }
 0x4b7   :  { %v686_v33 = vpop.f32.mrb[11].mxu1  ;;  %604 = vrot.lane.b32.xlu0 %v596_v32, %s882_s21 }
 0x51f   :  { %v367_v36 = vpop.permute.xlu1 %366 }
 0x520   :  { %373 = vst.msk [vmem:[#allocation11] sm:$0xff] %vm372_vm3, %v367_v36 }
 0x521   :  { %v369_v38 = vpop.permute.xlu0 %368 }
 0x522   :  { %374 = vst.msk [vmem:[#allocation11 + $0x8] sm:$0xff] %vm372_vm3, %v369_v38 }
 0x523   :  { %v485_v39 = vpop.permute.xlu1 %484 }
 0x524   :  { %491 = vst.msk [vmem:[#allocation11] sm:$0xff] %vm490_vm4, %v485_v39 }
 0x525   :  { %v487_v40 = vpop.permute.xlu0 %486 }
 0x526   :  { %492 = vst.msk [vmem:[#allocation11 + $0x8] sm:$0xff] %vm490_vm4, %v487_v40 }
 0x527   :  { %v603_v42 = vpop.permute.xlu1 %602 }
 0x528   :  { %609 = vst.msk [vmem:[#allocation11] sm:$0xff] %vm608_vm5, %v603_v42 }
 0x529   :  { %v605_v43 = vpop.permute.xlu0 %604 }
 0x52a   :  { %610 = vst.msk [vmem:[#allocation11 + $0x8] sm:$0xff] %vm608_vm5, %v605_v43 }
 0x52b   :  { %849 = shalt.err (!%p846_p2)
}
 0x52c   :  { %s850_s13 = scalar_lea.hbm %s1156_s5, 256 }
 0x52d   :  { %p851_p3 = scmp.ne.s32.totalorder %s1156_s5, %s850_s13  ;;  %p854_p4 = scmp.lt.u32.totalorder %s850_s13, %s1156_s5 }
 0x52f   :  { %p856_p5 = pnand %p854_p4, %p851_p3 }
 0x531   :  { %859 = shalt.err (!%p856_p5)
}
 0x532   :  { %s884_s1 = smov 128   ;;  %s885_s17 = smov 8  }
 0x533   :  { %622 = dma.vmem_to_hbm [thread:$0]  %s617_s9, 256, %s1156_s5, [#allocation4], %s884_s1, %s884_s1, %s885_s17  }
 0x534   :  { %866 = dma.done.wait [#allocation4], 256  }
 0x535   :  { %867 = vsyncadd [#allocation4], 4294967040 }
 0x536   :  { %626 = vsyncpa [#allocation3], 1 }
 0x537   :  { %627 = vsyncpa [#allocation6], 1 }
 0x538   :  { %628 = vsyncpa [#allocation9], 1 }
 0x539   :  { %629 = vsyncpa [#allocation4], 1 }

</bundles_post_ra>
